<compile_context>
chip_gen: v6e
topology: v6e:2x2x1
jax: 0.10.0
libtpu: 0.0.40
codegen_flags: <defaults>
</compile_context>

<pallas_src>
import numpy as np
import jax
import jax.numpy as jnp
from jax.experimental import pallas as pl
from jax.experimental.pallas import tpu as pltpu


def sage_mean_kernel(cols_ref, cnt_ref, a_ref, xk_ref, xs_ref, invdeg_ref,
                     wn_ref, ws_ref, b_ref, o_ref, acc_ref):
    # cols_ref  : (NBM, KMAX) i32 SMEM  nonzero column-block ids per row block
    # cnt_ref   : (NBM,)      i32 SMEM  number of nonzero column blocks per row block
    # a_ref     : (TM, TK)    i8        binary adjacency tile (dst rows, src cols)
    # xk_ref    : (TK, F_in)  bf16      source-node features for this column block
    # xs_ref    : (TM, F_in)  f32       this row block's own features (self term)
    # invdeg_ref: (TM, 1)     f32       1 / in-degree (0 for isolated nodes)
    # wn_ref    : (F_in, F_out_pad) f32 fc_neigh.weight (pre-transposed, padded)
    # ws_ref    : (F_in, F_out_pad) f32 fc_self.weight  (pre-transposed, padded)
    # b_ref     : (1, F_out_pad)    f32 fc_self.bias (padded)
    # o_ref     : (TM, F_out_pad)
    # acc_ref   : (TM, F_in)  f32 VMEM scratch: running neighbor-feature sum
    i = pl.program_id(0)
    k = pl.program_id(1)

    @pl.when(k == 0)
    def _():
        acc_ref[...] = jnp.zeros_like(acc_ref)

    # Accumulate only on real (nonzero) column blocks; padded steps are skipped.
    @pl.when(k < cnt_ref[i])
    def _():
        # int8 {0,1} -> bf16 is exact; native bf16 x bf16 MXU, f32 accumulate.
        a_bf = a_ref[...].astype(jnp.bfloat16)
        acc_ref[...] += jnp.dot(a_bf, xk_ref[...],
                                preferred_element_type=jnp.float32)

    @pl.when(k == pl.num_programs(1) - 1)
    def _():
        # mean aggregation: single f32 per-row scale after the full reduction
        h_agg = acc_ref[...] * invdeg_ref[...]
        # two small dots (avoids lane-axis concat relayout); fc_self stays f32
        out = jnp.dot(h_agg, wn_ref[...], preferred_element_type=jnp.float32)
        out = out + jnp.dot(xs_ref[...], ws_ref[...],
                            preferred_element_type=jnp.float32)
        o_ref[...] = (out + b_ref[...]).astype(o_ref.dtype)


def sage_conv_mean(adj, feat, w_neigh, w_self, b_self, *, tm=512, tk=1024):
    """SAGEConv-mean forward (aggregate-then-project, in_feats <= out_feats).

    adj     : [N, N] {0,1} adjacency, row i = destination node i.
    feat    : [N, F_in] f32 node features.
    w_neigh : [F_in, F_out] f32 fc_neigh.weight, pre-transposed.
    w_self  : [F_in, F_out] f32 fc_self.weight,  pre-transposed.
    b_self  : [F_out]       f32 fc_self.bias.
    """
    N, F_in = feat.shape
    F_out = w_neigh.shape[1]
    tm = min(tm, N)
    tk = min(tk, N)
    assert N % tm == 0 and N % tk == 0, "N must be divisible by tm and tk"
    nbm, nbk = N // tm, N // tk

    # ---- host-side preprocessing -------------------------------------------
    adj_np = np.asarray(adj, dtype=np.float32)
    adj_i8 = jnp.asarray(adj_np != 0, dtype=jnp.int8)           # 1-byte {0,1} stream
    deg = adj_np.sum(axis=1)
    inv_deg = np.where(deg > 0, 1.0 / np.maximum(deg, 1.0), 0.0).astype(np.float32)
    inv_deg2 = jnp.asarray(inv_deg.reshape(N, 1))

    # Block-sparsity structure: per row block, the list of nonzero column blocks.
    blk_nz = adj_np.reshape(nbm, tm, nbk, tk).sum(axis=(1, 3)) > 0   # [nbm, nbk]
    counts_np = blk_nz.sum(axis=1).astype(np.int32)                  # [nbm]
    kmax = max(1, int(counts_np.max()))
    cols_np = np.zeros((nbm, kmax), dtype=np.int32)
    for r in range(nbm):
        nz = np.nonzero(blk_nz[r])[0].astype(np.int32)
        if nz.size:
            cols_np[r, :nz.size] = nz
            cols_np[r, nz.size:] = nz[-1]     # clamp padding to a valid block
    cols = jnp.asarray(cols_np)
    counts = jnp.asarray(counts_np)

    # bf16 stream for the A @ X reduction; the f32 copy feeds the exact self term.
    feat_bf = feat.astype(jnp.bfloat16)

    # Lane-dense output: pad F_out to a multiple of 128 (unmasked stores).
    f_out_pad = ((F_out + 127) // 128) * 128
    wn_pad = jnp.pad(w_neigh.astype(jnp.float32), ((0, 0), (0, f_out_pad - F_out)))
    ws_pad = jnp.pad(w_self.astype(jnp.float32), ((0, 0), (0, f_out_pad - F_out)))
    b_pad = jnp.pad(b_self.astype(jnp.float32),
                    (0, f_out_pad - F_out)).reshape(1, f_out_pad)

    # (dst row blocks [parallel], nonzero src column blocks [reduction, LAST])
    grid = (nbm, kmax)

    nnzb = int(counts_np.sum())
    cost = pl.CostEstimate(
        flops=2 * nnzb * tm * tk * F_in + 4 * N * F_in * f_out_pad,
        transcendentals=0,
        bytes_accessed=(nnzb * tm * tk * 1          # adjacency (nonzero blocks only)
                        + nnzb * tk * F_in * 2      # bf16 source-feature tiles
                        + N * F_in * 4              # self features
                        + N * 4                     # 1/deg
                        + 2 * F_in * f_out_pad * 4  # weights
                        + N * f_out_pad * 4),       # output
    )

    # Double-buffered working set; cap scoped VMEM at 40 MiB (fits v7x's 64 MiB
    # as well as v5e/v6e's 128 MiB with headroom).
    working = (2 * tm * tk * 1 + 2 * tk * F_in * 2 + 2 * tm * F_in * 4
               + 2 * tm * 4 + 2 * 2 * F_in * f_out_pad * 4 + 2 * f_out_pad * 4
               + 2 * tm * f_out_pad * 4 + tm * F_in * 4)
    vmem_limit = int(min(max(4 * working, 16 * 2 ** 20), 40 * 2 ** 20))

    out = pl.pallas_call(
        sage_mean_kernel,
        out_shape=jax.ShapeDtypeStruct((N, f_out_pad), feat.dtype),
        grid_spec=pltpu.PrefetchScalarGridSpec(
            num_scalar_prefetch=2,        # cols, counts -> SMEM, fed to index_maps
            grid=grid,
            in_specs=[
                # adjacency: walk only the nonzero column blocks of row block i
                pl.BlockSpec((tm, tk), lambda i, k, cb, cc: (i, cb[i, k])),
                # matching bf16 source-feature tile
                pl.BlockSpec((tk, F_in), lambda i, k, cb, cc: (cb[i, k], 0)),
                # self features / 1-per-row inverse degree for this row block
                pl.BlockSpec((tm, F_in), lambda i, k, cb, cc: (i, 0)),
                pl.BlockSpec((tm, 1), lambda i, k, cb, cc: (i, 0)),
                # projection weights + bias (resident across the grid)
                pl.BlockSpec((F_in, f_out_pad), lambda i, k, cb, cc: (0, 0)),
                pl.BlockSpec((F_in, f_out_pad), lambda i, k, cb, cc: (0, 0)),
                pl.BlockSpec((1, f_out_pad), lambda i, k, cb, cc: (0, 0)),
            ],
            out_specs=pl.BlockSpec((tm, f_out_pad), lambda i, k, cb, cc: (i, 0)),
            scratch_shapes=[pltpu.VMEM((tm, F_in), jnp.float32)],
        ),
        compiler_params=pltpu.CompilerParams(
            dimension_semantics=("parallel", "arbitrary"),
            vmem_limit_bytes=vmem_limit,
        ),
        cost_estimate=cost,
    )(cols, counts, adj_i8, feat_bf, feat, inv_deg2, wn_pad, ws_pad, b_pad)
    return out[:, :F_out]


def xavier_uniform(key, shape, gain):
    # matches torch.nn.init.xavier_uniform_ for a Linear weight [out, in]
    fan_out, fan_in = shape
    a = gain * np.sqrt(6.0 / (fan_in + fan_out))
    return jax.random.uniform(key, shape, jnp.float32, -a, a)


if __name__ == "__main__":
    key = jax.random.PRNGKey(0)
    # in_feats <= out_feats -> aggregate-then-project (lin_before_mp = False)
    N, F_in, F_out = 512, 32, 64
    tm, tk = 128, 128     # N//tm = 4: even and >=4 -> balanced across v7x's 2 TCs

    k_feat, k_edge, k_wn, k_ws, k_b = jax.random.split(key, 5)

    # node features
    feat = jax.random.normal(k_feat, (N, F_in), jnp.float32)

    # deterministic sparse graph with locality (band of half-width 96, ~5%
    # density inside the band) -> several (tm, tk) adjacency blocks are entirely
    # empty, exercising the block-sparse skip + padded-step clamp paths.
    rnd = jax.random.uniform(k_edge, (N, N))
    rows = jnp.arange(N)[:, None]
    cidx = jnp.arange(N)[None, :]
    band = jnp.abs(rows - cidx) < 96
    adj = ((rnd < 0.05) & band).astype(jnp.float32)   # [dst, src] binary adjacency

    # parameters (deterministic init, matching the module's reset_parameters)
    gain = float(np.sqrt(2.0))  # nn.init.calculate_gain('relu')
    w_neigh_t = xavier_uniform(k_wn, (F_out, F_in), gain)   # fc_neigh.weight [out, in]
    w_self_t = xavier_uniform(k_ws, (F_out, F_in), gain)    # fc_self.weight  [out, in]
    bound = 1.0 / np.sqrt(F_in)                             # nn.Linear default bias init
    b_self = jax.random.uniform(k_b, (F_out,), jnp.float32, -bound, bound)

    # pre-transpose weights to [F_in, F_out] for row-major matmuls in the kernel
    w_neigh = w_neigh_t.T
    w_self = w_self_t.T

    out = sage_conv_mean(adj, feat, w_neigh, w_self, b_self, tm=tm, tk=tk)
    out = jax.block_until_ready(out)

    # reference (plain JAX, f32 features)
    deg = adj.sum(axis=1)
    inv_deg = jnp.where(deg > 0, 1.0 / jnp.maximum(deg, 1.0), 0.0)
    adj_norm = adj * inv_deg[:, None]
    ref = (adj_norm @ feat) @ w_neigh + feat @ w_self + b_self[None, :]

    assert out.shape == (N, F_out)
    # Tolerance loosened vs the f32 reference: the neighbor path streams bf16
    # features into the MXU (~2^-9 relative error), as recommended by the review.
    assert jnp.allclose(out, ref, atol=5e-2, rtol=5e-2), \
        float(jnp.max(jnp.abs(out - ref)))

    print("KERNEL_OK")
</pallas_src>

<mosaic_0001>
module attributes {stable_mosaic.version = 11 : i64} {
  func.func @sage_mean_kernel(%arg0: i32, %arg1: i32, %arg2: memref<4x3xi32, #tpu.memory_space<smem>>, %arg3: memref<4xi32, #tpu.memory_space<smem>>, %arg4: memref<128x128xi8, #tpu.memory_space<vmem>>, %arg5: memref<128x32xbf16, #tpu.memory_space<vmem>>, %arg6: memref<128x32xf32, #tpu.memory_space<vmem>>, %arg7: memref<128x1xf32, #tpu.memory_space<vmem>>, %arg8: memref<32x128xf32, #tpu.memory_space<vmem>>, %arg9: memref<32x128xf32, #tpu.memory_space<vmem>>, %arg10: memref<1x128xf32, #tpu.memory_space<vmem>>, %arg11: memref<128x128xf32, #tpu.memory_space<vmem>>, %arg12: memref<128x32xf32, #tpu.memory_space<vmem>>) attributes {dimension_semantics = [#tpu.dimension_semantics<parallel>, #tpu.dimension_semantics<arbitrary>], iteration_bounds = array<i64: 4, 3>, scalar_prefetch = 2 : i64, scratch_operands = 1 : i64, tpu.core_type = #tpu.core_type<tc>, window_params = [{transform_indices = @transform_0, window_bounds = array<i64: 128, 128>}, {transform_indices = @transform_1, window_bounds = array<i64: 128, 32>}, {transform_indices = @transform_2, window_bounds = array<i64: 128, 32>}, {transform_indices = @transform_3, window_bounds = array<i64: 128, 1>}, {pipeline_mode = #tpu.pipeline_mode<synchronous>, transform_indices = @transform_4, window_bounds = array<i64: 32, 128>}, {pipeline_mode = #tpu.pipeline_mode<synchronous>, transform_indices = @transform_5, window_bounds = array<i64: 32, 128>}, {pipeline_mode = #tpu.pipeline_mode<synchronous>, transform_indices = @transform_6, window_bounds = array<i64: 1, 128>}, {transform_indices = @transform_7, window_bounds = array<i64: 128, 128>}]} {
    %c0_i32 = arith.constant 0 : i32
    %0 = arith.cmpi eq, %arg1, %c0_i32 : i32
    %1 = arith.extui %0 : i1 to i32
    %c0_i32_0 = arith.constant 0 : i32
    %2 = arith.cmpi ne, %1, %c0_i32_0 : i32
    scf.if %2 {
      %cst = arith.constant 0.000000e+00 : f32
      %11 = vector.broadcast %cst : f32 to vector<128x32xf32>
      %c0 = arith.constant 0 : index
      %c0_3 = arith.constant 0 : index
      %12 = vector.load %arg12[%c0, %c0_3] : memref<128x32xf32, #tpu.memory_space<vmem>>, vector<128x32xf32>
      tpu.vector_store %arg12[%c0, %c0_3], %11 {strides = array<i32>} : memref<128x32xf32, #tpu.memory_space<vmem>>, vector<128x32xf32>,
    } else {
    }
    %3 = arith.index_cast %arg0 : i32 to index
    %4 = memref.load %arg3[%3] : memref<4xi32, #tpu.memory_space<smem>>
    %5 = arith.cmpi slt, %arg1, %4 : i32
    %6 = arith.extui %5 : i1 to i32
    %c0_i32_1 = arith.constant 0 : i32
    %7 = arith.cmpi ne, %6, %c0_i32_1 : i32
    scf.if %7 {
      %c0 = arith.constant 0 : index
      %c0_3 = arith.constant 0 : index
      %11 = vector.load %arg4[%c0, %c0_3] : memref<128x128xi8, #tpu.memory_space<vmem>>, vector<128x128xi8>
      %12 = arith.sitofp %11 : vector<128x128xi8> to vector<128x128xbf16>
      %c0_4 = arith.constant 0 : index
      %c0_5 = arith.constant 0 : index
      %13 = vector.load %arg12[%c0_4, %c0_5] : memref<128x32xf32, #tpu.memory_space<vmem>>, vector<128x32xf32>
      %c0_6 = arith.constant 0 : index
      %c0_7 = arith.constant 0 : index
      %14 = vector.load %arg5[%c0_6, %c0_7] : memref<128x32xbf16, #tpu.memory_space<vmem>>, vector<128x32xbf16>
      %cst = arith.constant dense<0.000000e+00> : vector<128x32xf32>
      %15 = tpu.matmul %12, %14, %cst {dimension_numbers = #tpu.dot_dimension_numbers<[1], [0], [0], [1], [0, 0, 1, 1], [], []>} : vector<128x128xbf16>, vector<128x32xbf16>, vector<128x32xf32> -> vector<128x32xf32>
      %16 = arith.addf %13, %15 : vector<128x32xf32>
      %c0_8 = arith.constant 0 : index
      %c0_9 = arith.constant 0 : index
      %17 = vector.load %arg12[%c0_8, %c0_9] : memref<128x32xf32, #tpu.memory_space<vmem>>, vector<128x32xf32>
      tpu.vector_store %arg12[%c0_8, %c0_9], %16 {strides = array<i32>} : memref<128x32xf32, #tpu.memory_space<vmem>>, vector<128x32xf32>,
    } else {
    }
    %c2_i32 = arith.constant 2 : i32
    %8 = arith.cmpi eq, %arg1, %c2_i32 : i32
    %9 = arith.extui %8 : i1 to i32
    %c0_i32_2 = arith.constant 0 : i32
    %10 = arith.cmpi ne, %9, %c0_i32_2 : i32
    scf.if %10 {
      %c0 = arith.constant 0 : index
      %c0_3 = arith.constant 0 : index
      %11 = vector.load %arg12[%c0, %c0_3] : memref<128x32xf32, #tpu.memory_space<vmem>>, vector<128x32xf32>
      %c0_4 = arith.constant 0 : index
      %c0_5 = arith.constant 0 : index
      %12 = vector.load %arg7[%c0_4, %c0_5] : memref<128x1xf32, #tpu.memory_space<vmem>>, vector<128x1xf32>
      %13 = vector.broadcast %12 : vector<128x1xf32> to vector<128x32xf32>
      %14 = arith.mulf %11, %13 : vector<128x32xf32>
      %c0_6 = arith.constant 0 : index
      %c0_7 = arith.constant 0 : index
      %15 = vector.load %arg8[%c0_6, %c0_7] : memref<32x128xf32, #tpu.memory_space<vmem>>, vector<32x128xf32>
      %cst = arith.constant dense<0.000000e+00> : vector<128x128xf32>
      %16 = tpu.matmul %14, %15, %cst {dimension_numbers = #tpu.dot_dimension_numbers<[1], [0], [0], [1], [0, 0, 1, 1], [], []>} : vector<128x32xf32>, vector<32x128xf32>, vector<128x128xf32> -> vector<128x128xf32>
      %c0_8 = arith.constant 0 : index
      %c0_9 = arith.constant 0 : index
      %17 = vector.load %arg6[%c0_8, %c0_9] : memref<128x32xf32, #tpu.memory_space<vmem>>, vector<128x32xf32>
      %c0_10 = arith.constant 0 : index
      %c0_11 = arith.constant 0 : index
      %18 = vector.load %arg9[%c0_10, %c0_11] : memref<32x128xf32, #tpu.memory_space<vmem>>, vector<32x128xf32>
      %cst_12 = arith.constant dense<0.000000e+00> : vector<128x128xf32>
      %19 = tpu.matmul %17, %18, %cst_12 {dimension_numbers = #tpu.dot_dimension_numbers<[1], [0], [0], [1], [0, 0, 1, 1], [], []>} : vector<128x32xf32>, vector<32x128xf32>, vector<128x128xf32> -> vector<128x128xf32>
      %20 = arith.addf %16, %19 : vector<128x128xf32>
      %c0_13 = arith.constant 0 : index
      %c0_14 = arith.constant 0 : index
      %21 = vector.load %arg10[%c0_13, %c0_14] : memref<1x128xf32, #tpu.memory_space<vmem>>, vector<1x128xf32>
      %22 = vector.broadcast %21 : vector<1x128xf32> to vector<128x128xf32>
      %23 = arith.addf %20, %22 : vector<128x128xf32>
      %c0_15 = arith.constant 0 : index
      %c0_16 = arith.constant 0 : index
      %24 = vector.load %arg11[%c0_15, %c0_16] : memref<128x128xf32, #tpu.memory_space<vmem>>, vector<128x128xf32>
      tpu.vector_store %arg11[%c0_15, %c0_16], %23 {strides = array<i32>} : memref<128x128xf32, #tpu.memory_space<vmem>>, vector<128x128xf32>,
    } else {
    }
    return
  }
  func.func @transform_0(%arg0: i32, %arg1: i32, %arg2: memref<4x3xi32, #tpu.memory_space<smem>>, %arg3: memref<4xi32, #tpu.memory_space<smem>>) -> (i32, i32) {
    %0 = arith.index_cast %arg0 : i32 to index
    %1 = arith.index_cast %arg1 : i32 to index
    %2 = memref.load %arg2[%0, %1] : memref<4x3xi32, #tpu.memory_space<smem>>
    %c0_i32 = arith.constant 0 : i32
    return %arg0, %2 : i32, i32
  }
  func.func @transform_1(%arg0: i32, %arg1: i32, %arg2: memref<4x3xi32, #tpu.memory_space<smem>>, %arg3: memref<4xi32, #tpu.memory_space<smem>>) -> (i32, i32) {
    %0 = arith.index_cast %arg0 : i32 to index
    %1 = arith.index_cast %arg1 : i32 to index
    %2 = memref.load %arg2[%0, %1] : memref<4x3xi32, #tpu.memory_space<smem>>
    %c0_i32 = arith.constant 0 : i32
    %c0_i32_0 = arith.constant 0 : i32
    return %2, %c0_i32 : i32, i32
  }
  func.func @transform_2(%arg0: i32, %arg1: i32, %arg2: memref<4x3xi32, #tpu.memory_space<smem>>, %arg3: memref<4xi32, #tpu.memory_space<smem>>) -> (i32, i32) {
    %c0_i32 = arith.constant 0 : i32
    %c0_i32_0 = arith.constant 0 : i32
    return %arg0, %c0_i32 : i32, i32
  }
  func.func @transform_3(%arg0: i32, %arg1: i32, %arg2: memref<4x3xi32, #tpu.memory_space<smem>>, %arg3: memref<4xi32, #tpu.memory_space<smem>>) -> (i32, i32) {
    %c0_i32 = arith.constant 0 : i32
    %c0_i32_0 = arith.constant 0 : i32
    return %arg0, %c0_i32 : i32, i32
  }
  func.func @transform_4(%arg0: i32, %arg1: i32, %arg2: memref<4x3xi32, #tpu.memory_space<smem>>, %arg3: memref<4xi32, #tpu.memory_space<smem>>) -> (i32, i32) {
    %c0_i32 = arith.constant 0 : i32
    %c0_i32_0 = arith.constant 0 : i32
    %c0_i32_1 = arith.constant 0 : i32
    return %c0_i32, %c0_i32_0 : i32, i32
  }
  func.func @transform_5(%arg0: i32, %arg1: i32, %arg2: memref<4x3xi32, #tpu.memory_space<smem>>, %arg3: memref<4xi32, #tpu.memory_space<smem>>) -> (i32, i32) {
    %c0_i32 = arith.constant 0 : i32
    %c0_i32_0 = arith.constant 0 : i32
    %c0_i32_1 = arith.constant 0 : i32
    return %c0_i32, %c0_i32_0 : i32, i32
  }
  func.func @transform_6(%arg0: i32, %arg1: i32, %arg2: memref<4x3xi32, #tpu.memory_space<smem>>, %arg3: memref<4xi32, #tpu.memory_space<smem>>) -> (i32, i32) {
    %c0_i32 = arith.constant 0 : i32
    %c0_i32_0 = arith.constant 0 : i32
    %c0_i32_1 = arith.constant 0 : i32
    return %c0_i32, %c0_i32_0 : i32, i32
  }
  func.func @transform_7(%arg0: i32, %arg1: i32, %arg2: memref<4x3xi32, #tpu.memory_space<smem>>, %arg3: memref<4xi32, #tpu.memory_space<smem>>) -> (i32, i32) {
    %c0_i32 = arith.constant 0 : i32
    %c0_i32_0 = arith.constant 0 : i32
    return %arg0, %c0_i32 : i32, i32
  }
}

</mosaic_0001>

<bundles_post_ra>
// kernel: tpu_custom_call.1
= control target key start
LH: loop header
LB: loop body
LE: loop exit
PB: predicated region body
PF: predicated region fallthrough
CT: control target
= control target key end

     0   :  { %s2389_s0 = inlined_call_operand.vmem [shape: s32[4,3], index: 0, kind: input, shape index: {}]   ;;  %s2390_s2 = inlined_call_operand.vmem [shape: s8[512,512], index: 2, kind: input, shape index: {}]   ;;  %s2391_s3 = inlined_call_operand.vmem [shape: bf16[512,32], index: 3, kind: input, shape index: {}]   ;;  %s2392_s4 = inlined_call_operand.vmem [shape: f32[512,32], index: 4, kind: input, shape index: {}]   ;;  %s2393_s5 = inlined_call_operand.vmem [shape: f32[512,1], index: 5, kind: input, shape index: {}]   ;;  %s2394_s6 = inlined_call_operand.vmem [shape: f32[32,128], index: 6, kind: input, shape index: {}]   ;;  %s2395_s7 = inlined_call_operand.vmem [shape: f32[32,128], index: 7, kind: input, shape index: {}]   ;;  %s2396_s8 = inlined_call_operand.vmem [shape: f32[1,128], index: 8, kind: input, shape index: {}]   ;;  %s2397_s9 = inlined_call_operand.hbm [shape: f32[512,128], index: 9, kind: output, shape index: {}]   ;;  %s2398_s1 = inlined_call_operand.vmem [shape: s32[4], index: 1, kind: input, shape index: {}]  }
   0x1   :  { %2406 = sst [smem:[#allocation18_spill]] %s2390_s2  ;;  %s14_s11 = sshll.u32 %s2389_s0, 4  ;;  %s15_s11 = int_to_ptr.vmem [resolvable:$true] %s14_s11 }
   0x2   :  { %2407 = sst [smem:[#allocation19_spill]] %s2396_s8  ;;  %s18_s14 = sshll.u32 %s2398_s1, 4  ;;  %s19_s14 = int_to_ptr.vmem [resolvable:$true] %s18_s14 }
   0x3   :  { %2408 = sst [smem:[#allocation20_spill]] %s2397_s9  ;;  %s1816_s15 = scalar_lea.vmem %s15_s11, 64 }
   0x4   :  { %p1817_p0 = scmp.ne.s32.totalorder %s15_s11, %s1816_s15  ;;  %p1821_p1 = scmp.lt.s32.totalorder %s15_s11, %s15_s11 }
   0x5   :  { %p1822_p2 = scmp.lt.s32.totalorder %s1816_s15, %s1816_s15 }
   0x7   :  { %p1823_p3 = por %p1822_p2, %p1821_p1 }
   0x9   :  { %p1824_p4 = pnand %p1823_p3, %p1817_p0 }
   0xb   :  { %1827 = shalt.err (!%p1824_p4)  }
   0xc   :  { %s1952_s16 = smov [#allocation4]   ;;  %s1828_s17 = scalar_lea.vmem %s19_s14, 16 }
   0xd   :  { %17 = dma.vmem_to_smem %s15_s11, 64, %s1952_s16, [#allocation3] }
   0xe   :  { %p1829_p5 = scmp.ne.s32.totalorder %s19_s14, %s1828_s17  ;;  %p1833_p6 = scmp.lt.s32.totalorder %s19_s14, %s19_s14 }
   0xf   :  { %p1834_p7 = scmp.lt.s32.totalorder %s1828_s17, %s1828_s17 }
  0x11   :  { %p1835_p8 = por %p1834_p7, %p1833_p6 }
  0x13   :  { %p1836_p9 = pnand %p1835_p8, %p1829_p5 }
  0x15   :  { %1839 = shalt.err (!%p1836_p9)  }
  0x16   :  { %s1953_s0 = smov [#allocation5]  }
  0x17   :  { %21 = dma.vmem_to_smem %s19_s14, 16, %s1953_s0, [#allocation3] }
  0x18   :  { %1906 = dma.done.wait [#allocation3], 80 }
  0x19   :  { %1907 = vsyncadd [#allocation3], 4294967216 }
  0x1a   :  { %23 = sfence }
  0x1b   :  { %24 = vsyncpa [#allocation8], 0 }
  0x1c   :  { %26 = vsyncpa [#allocation8 + $0x1], 0  ;;  %s2015_s1 = smov 0   ;;  %s2017_s18 = smov 0  }
  0x1d   :  { %s2019_s19 = smov 0   ;;  %s2021_s20 = smov 0  }
  0x1e   :  { %s2023_s21 = smov 0   ;;  %s2025_s22 = smov 0  }
  0x1f   :  { %s2027_s23 = smov 0   ;;  %s2029_s24 = smov 0  }
  0x20   :  { %s2031_s25 = smov 0   ;;  %s2033_s26 = smov 0  }
  0x21 LB: > { %2409 = sst [smem:[#allocation11_spill]] %s1930_s21  ;;  %s41_s28 = sadd.s32 1, %s1942_s24  ;;  %s1950_s26 = sphi %s2033_s26, %s32_s26   ;;  %s1946_s25 = sphi %s2031_s25, %s2430_s25   ;;  %s1942_s24 = sphi %s2029_s24, %s2429_s24   ;;  %s1938_s23 = sphi %s2027_s23, %s2428_s23   ;;  %s1934_s22 = sphi %s2025_s22, %s2427_s22   ;;  %s1930_s21 = sphi %s2023_s21, %s2426_s21   ;;  %s1926_s20 = sphi %s2021_s20, %s2425_s20   ;;  %s1922_s19 = sphi %s2019_s19, %s2433_s19   ;;  %s1918_s18 = sphi %s2017_s18, %s2432_s18   ;;  %s1914_s1 = sphi %s2015_s1, %s2431_s1  }
  0x22   : > { %2410 = sst [smem:[#allocation12_spill]] %s1942_s24  ;;  %s44_s29 = sadd.s32 1, %s1946_s25 }
  0x23   : > { %2411 = sst [smem:[#allocation13_spill]] %s1946_s25  ;;  %p42_p10 = scmp.ge.s32.totalorder %s41_s28, 3 }
  0x24   : > { %s48_s30 = sshra.s32 %s1942_s24, 7  ;;  %s53_s11 = sand.u32 127, %s1942_s24 }
  0x25   : > { %s50_s10 = sadd.s32 %s1946_s25, %s48_s30  ;;  %s2435_s28 = smov (%p42_p10, %s41_s28), 0 }
  0x26   : > { %2412 = sst [smem:[#allocation14_spill]] %s2435_s28  ;;  %s2437_s29 = smov (!%p42_p10, %s44_s29), %s1946_s25 }
  0x27   : > { %s1472_s12 = sadd.s32 4294967294, %s1950_s26   ;;  %s1473_s13 = sshll.u32 %s50_s10, 7 }
  0x28   : > { %p46_p11 = scmp.ge.s32.totalorder %s2437_s29, 4  ;;  %s54_s14 = sadd.s32 %s1473_s13, %s53_s11 }
  0x29   : > { %s55_s15 = sld [smem:[#allocation4 + %s54_s14]]  ;;  %s56_s16 = sshra.s32 %s2435_s28, 7 }
  0x2a   : > { %s2439_s29 = smov (%p46_p11, %s2437_s29), 0  ;;  %s61_s17 = sand.u32 127, %s2435_s28 }
  0x2b   : > { %2413 = sst [smem:[#allocation15_spill]] %s2439_s29  ;;  %p76_p12 = scmp.ne.s32.totalorder %s1930_s21, %s1926_s20 }
  0x2c   : > { %s58_s0 = sadd.s32 %s56_s16, %s2439_s29  ;;  %s64_s30 = ssub.s32 %s1946_s25, %s2439_s29 }
  0x2d   : > { %s1474_s10 = sshll.u32 %s58_s0, 7  ;;  %p77_p13 = scmp.eq.s32.totalorder %s1950_s26, 0 }
  0x2e   : > { %s62_s27 = sadd.s32 %s1474_s10, %s61_s17  ;;  %p250_p0 = scmp.eq.s32.totalorder %s64_s30, 0 }
  0x2f   : > { %s63_s11 = sld [smem:[#allocation4 + %s62_s27]]  ;;  %p2085_p1 = por %p77_p13, %p76_p12 }
  0x30   : > { %s252_s24 = sadd.s32 1, %s1922_s19  ;;  %p262_p2 = scmp.ne.s32.totalorder %s1922_s19, %s1918_s18 }
  0x31   : > { %s2093_s9 = scalar_select %p250_p0, %s1922_s19, %s252_s24  }
  0x32   : > { %s2416_s8 = sadd.s32 4294967295, %s1950_s26   ;;  %p268_p4 = scmp.ne.s32.totalorder %s1918_s18, %s1914_s1 }
  0x33   : > { %2415 = sst [smem:[#allocation16_spill]] %s2093_s9  ;;  %p263_p3 = scmp.eq.s32.totalorder %s2416_s8, 11 }
  0x34   : > { %p269_p5 = scmp.eq.s32.totalorder %s1472_s12, 11  ;;  %s69_s10 = sadd.s32 1, %s1930_s21 }
  0x35   : > { %p2099_p6 = por %p263_p3, %p262_p2  ;;  %s65_s17 = ssub.s32 %s55_s15, %s63_s11 }
  0x36   : > { %p2103_p7 = por %p269_p5, %p268_p4  ;;  %s66_s27 = sor.u32 %s65_s17, %s64_s30 }
  0x37   : > { %p67_p8 = scmp.eq.s32.totalorder %s66_s27, 0  ;;  %p1478_p9 = scmp.ge.s32.totalorder %s1950_s26, 12 }
  0x39   : > { %s2109_s29 = scalar_select %p67_p8, %s1930_s21, %s69_s10  }
  0x3a   : > { %294 = sbr.rel (%p1478_p9) target bundleno = 77 (0x4d), region = 28 }
  0x3b   : > { %2419 = sst [smem:[#allocation17_spill]] %s2109_s29 }
  0x3f   : > { %297 = sbr.rel (!%p2085_p1) target bundleno = 77 (0x4d), region = 32  ;;  %s309_s8 = sld [smem:[#allocation4 + %s54_s14]] (%p2085_p1) }
  0x40   : > { %s299_s24 = sand.u32 (%p2085_p1), 1, %s1930_s21   ;;  %s1543_s12 = sshll.u32 (%p2085_p1), %s1946_s25, 4 }
  0x41   : > { %s1479_s15 = sshll.u32 (%p2085_p1), %s299_s24, 5  ;;  %s2420_s2 = sld [smem:[#allocation18_spill]] (%p2085_p1) }
  0x42   : > { %s301_s27 = scalar_lea.vmem (%p2085_p1), [#allocation6], %s1479_s15 }
  0x45   : > { %s312_s11 = sadd.s32 %s1543_s12, %s309_s8 }
  0x46   : > { %s1483_s28 = sshll.u32 %s312_s11, 3 }
  0x47   : > { %s314_s17 = scalar_lea.vmem %s2420_s2, %s1483_s28 }
  0x48   : > { %v349_v0 = vld [vmem:[%s314_s17] sm:$0xff] }
  0x49   : > { %v351_v1 = vld [vmem:[%s314_s17 + $0x20] sm:$0xff]  ;;  %350 = vst [vmem:[%s301_s27] sm:$0xff] %v349_v0 }
  0x4a   : > { %v353_v2 = vld [vmem:[%s314_s17 + $0x40] sm:$0xff]  ;;  %352 = vst [vmem:[%s301_s27 + $0x8] sm:$0xff] %v351_v1 }
  0x4b   : > { %354 = vst [vmem:[%s301_s27 + $0x10] sm:$0xff] %v353_v2  ;;  %v355_v3 = vld [vmem:[%s314_s17 + $0x60] sm:$0xff] }
  0x4c   : > { %356 = vst [vmem:[%s301_s27 + $0x18] sm:$0xff] %v355_v3 }
  0x4d PF: > { %p1484_p10 = scmp.ge.s32.totalorder %s1950_s26, 1  ;;  %p404_p11 = scmp.lt.s32.totalorder %s1950_s26, 13 }
  0x4f   : > { %p405_p12 = pnand %p1484_p10, %p404_p11 }
  0x50   : > { %s411_s9 = sand.u32 (!%p405_p12), 1, %s1926_s20   ;;  %s2404_s28 = sand.u32 (!%p405_p12), 1, %s1918_s18  }
  0x51   : > { %408 = sbr.rel (%p405_p12) target bundleno = 756 (0x2f4), region = 82  ;;  %s1485_s14 = sshll.u32 (!%p405_p12), %s411_s9, 5 }
  0x52   : > { %s1486_s13 = sshll.u32 (!%p405_p12), %s2404_s28, 7  ;;  %s474_s10 = sshra.s32 (!%p405_p12), %s1934_s22, 7 }
  0x53   : > { %s479_s8 = sand.u32 (!%p405_p12), 127, %s1934_s22  ;;  %s476_s24 = sadd.s32 (!%p405_p12), %s1938_s23, %s474_s10 }
  0x54   : > { %s1490_s12 = sshll.u32 (!%p405_p12), %s1938_s23, 4  ;;  %s1487_s15 = sshll.u32 (!%p405_p12), %s476_s24, 7 }
  0x55   : > { %p497_p13 = scmp.lt.s32.totalorder (!%p405_p12), %s1490_s12, 63  ;;  %s480_s11 = sadd.s32 (!%p405_p12), %s1487_s15, %s479_s8 }
  0x56   : > { %s481_s30 = sld [smem:[#allocation4 + %s480_s11]]  ;;  %s2146_s15 = scalar_lea.vmem [#allocation7], %s1486_s13 }
  0x57   : > { %s2441_s12 = smov (!%p497_p13, %s1490_s12), 63  ;;  %p1494_p1 = scmp.ne.s32.totalorder %s1934_s22, 0 }
  0x58   : > { %s1491_s17 = sshll.u32 %s2441_s12, 3  ;;  %s2144_s12 = scalar_lea.vmem [#allocation6], %s1485_s14 }
  0x59   : > { %s2132_s25 = scalar_lea.vmem %s2392_s4, %s1491_s17  ;;  %s2137_s9 = scalar_lea.vmem %s2393_s5, %s1491_s17 }
  0x5c   : > { %s1488_s28 = sshll.u32 %s481_s30, 4 }
  0x5d   : > { %p483_p0 = scmp.lt.s32.totalorder %s1488_s28, 63  ;;  %513 = sbr.rel (%p1494_p1) target bundleno = 107 (0x6b), region = 90 }
  0x5f   : > { %s2443_s28 = smov (!%p483_p0, %s1488_s28), 63 }
  0x60   : > { %s1489_s10 = sshll.u32 %s2443_s28, 2 }
  0x61   : > { %s2142_s8 = scalar_lea.vmem %s2391_s3, %s1489_s10 }
  0x62   : > { %vm514_vm0 = vcmask 261120   ;;  %v1954_v4 = vmov 0.0  }
  0x63   : > { %515 = vst.msk [vmem:[#allocation2] sm:$0xff] %vm514_vm0, %v1954_v4  ;;  %516 = vst.msk [vmem:[#allocation2 + $0x8] sm:$0xff] %vm514_vm0, %v1954_v4 }
  0x64   : > { %517 = vst.msk [vmem:[#allocation2 + $0x10] sm:$0xff] %vm514_vm0, %v1954_v4  ;;  %518 = vst.msk [vmem:[#allocation2 + $0x18] sm:$0xff] %vm514_vm0, %v1954_v4 }
  0x65   : > { %519 = vst.msk [vmem:[#allocation2 + $0x20] sm:$0xff] %vm514_vm0, %v1954_v4  ;;  %520 = vst.msk [vmem:[#allocation2 + $0x28] sm:$0xff] %vm514_vm0, %v1954_v4 }
  0x66   : > { %521 = vst.msk [vmem:[#allocation2 + $0x30] sm:$0xff] %vm514_vm0, %v1954_v4  ;;  %522 = vst.msk [vmem:[#allocation2 + $0x38] sm:$0xff] %vm514_vm0, %v1954_v4 }
  0x67   : > { %523 = vst.msk [vmem:[#allocation2 + $0x40] sm:$0xff] %vm514_vm0, %v1954_v4  ;;  %524 = vst.msk [vmem:[#allocation2 + $0x48] sm:$0xff] %vm514_vm0, %v1954_v4 }
  0x68   : > { %525 = vst.msk [vmem:[#allocation2 + $0x50] sm:$0xff] %vm514_vm0, %v1954_v4  ;;  %526 = vst.msk [vmem:[#allocation2 + $0x58] sm:$0xff] %vm514_vm0, %v1954_v4 }
  0x69   : > { %527 = vst.msk [vmem:[#allocation2 + $0x60] sm:$0xff] %vm514_vm0, %v1954_v4  ;;  %528 = vst.msk [vmem:[#allocation2 + $0x68] sm:$0xff] %vm514_vm0, %v1954_v4 }
  0x6a   : > { %529 = vst.msk [vmem:[#allocation2 + $0x70] sm:$0xff] %vm514_vm0, %v1954_v4  ;;  %530 = vst.msk [vmem:[#allocation2 + $0x78] sm:$0xff] %vm514_vm0, %v1954_v4 }
  0x6b PF: > { %s531_s2 = sld [smem:[#allocation5 + %s1938_s23]] }
  0x71   : > { %p1495_p2 = scmp.ge.s32.totalorder %s1934_s22, %s531_s2 }
  0x73   : > { %535 = sbr.rel (%p1495_p2) target bundleno = 363 (0x16b), region = 94 }
  0x78   : > { %v1806_v5 = vld [vmem:[%s2142_s8 + $0x38] sm:$0xff]   ;;  %v1807_v6 = vld [vmem:[%s2142_s8 + $0x30] sm:$0xff]   ;;  %v1808_v7 = vld [vmem:[%s2142_s8 + $0x28] sm:$0xff]   ;;  %vm741_vm1 = vcmask 261120  }
  0x79   : > { %1601 = vmatprep.subr.bf16.mxu0 %v1806_v5  ;;  %1697 = vmatprep.subr.bf16.mxu1 %v1806_v5  ;;  %v1809_v8 = vld [vmem:[%s2142_s8 + $0x20] sm:$0xff]   ;;  %v538_v10 = vld [vmem:[%s2144_s12 + $0x10] sm:$0xff]  ;;  %v1810_v13 = vld [vmem:[%s2142_s8 + $0x18] sm:$0xff]  }
  0x7a   : > { %1602 = vmatpush3.bf16.msra.mxu0 %v1806_v5  ;;  %1705 = vmatpush3.bf16.msra.mxu1 %v1806_v5  ;;  %v536_v9 = vld [vmem:[%s2144_s12] sm:$0xff]  ;;  %v544_v12 = vunpack.c.l.s8.bf16 %v538_v10  ;;  %v1811_v14 = vld [vmem:[%s2142_s8 + $0x10] sm:$0xff]   ;;  %v1812_v15 = vld [vmem:[%s2142_s8 + $0x8] sm:$0xff]   ;;  %v545_v20 = vunpack.c.h.s8.bf16 %v538_v10 }
  0x7b   : > { %1603 = vmatprep.subr.bf16.mxu0 %v1807_v6  ;;  %1698 = vmatprep.subr.bf16.mxu1 %v1807_v6  ;;  %v540_v11 = vunpack.c.l.s8.bf16 %v536_v9  ;;  %v1813_v16 = vld [vmem:[%s2142_s8] sm:$0xff]   ;;  %v537_v17 = vld [vmem:[%s2144_s12 + $0x8] sm:$0xff]  ;;  %v539_v18 = vld [vmem:[%s2144_s12 + $0x18] sm:$0xff]  ;;  %v541_v19 = vunpack.c.h.s8.bf16 %v536_v9 }
  0x7c   : > { %1625 = vmatprep.mubr.bf16.mxu1 %v544_v12  ;;  %v542_v21 = vunpack.c.l.s8.bf16 %v537_v17  ;;  %v546_v22 = vunpack.c.l.s8.bf16 %v539_v18  ;;  %v543_v23 = vunpack.c.h.s8.bf16 %v537_v17  ;;  %v547_v24 = vunpack.c.h.s8.bf16 %v539_v18  ;;  %v550_v25 = vld [vmem:[#allocation2 + $0x10] sm:$0xff]  ;;  %v548_v29 = vld [vmem:[#allocation2] sm:$0xff]  ;;  %v551_v35 = vld [vmem:[#allocation2 + $0x18] sm:$0xff] }
  0x7d   : > { %1617 = vmatprep.mubr.bf16.mxu0 %v540_v11  ;;  %v558_v26 = vld [vmem:[#allocation2 + $0x50] sm:$0xff]  ;;  %v556_v30 = vld [vmem:[#allocation2 + $0x40] sm:$0xff]  ;;  %v559_v36 = vld [vmem:[#allocation2 + $0x58] sm:$0xff] }
  0x7e   : > { %1604 = vmatpush3.bf16.msra.mxu0 %v1807_v6  ;;  %1706 = vmatpush3.bf16.msra.mxu1 %v1807_v6  ;;  %v549_v41 = vld [vmem:[#allocation2 + $0x8] sm:$0xff]  ;;  %v554_v47 = vld [vmem:[#allocation2 + $0x30] sm:$0xff]  ;;  %v552_v53 = vld [vmem:[#allocation2 + $0x20] sm:$0xff] }
  0x7f   : > { %1605 = vmatprep.subr.bf16.mxu0 %v1808_v7  ;;  %1699 = vmatprep.subr.bf16.mxu1 %v1808_v7  ;;  %v557_v42 = vld [vmem:[#allocation2 + $0x48] sm:$0xff]  ;;  %v562_v48 = vld [vmem:[#allocation2 + $0x70] sm:$0xff]  ;;  %v560_v54 = vld [vmem:[#allocation2 + $0x60] sm:$0xff] }
  0x80   : > { %v555_v59 = vld [vmem:[#allocation2 + $0x38] sm:$0xff]  ;;  %v553_v1 = vld [vmem:[#allocation2 + $0x28] sm:$0xff] }
  0x81   : > { %v563_v60 = vld [vmem:[#allocation2 + $0x78] sm:$0xff]  ;;  %v561_v2 = vld [vmem:[#allocation2 + $0x68] sm:$0xff] }
  0x82   : > { %1606 = vmatpush3.bf16.msra.mxu0 %v1808_v7  ;;  %1707 = vmatpush3.bf16.msra.mxu1 %v1808_v7 }
  0x83   : > { %1607 = vmatprep.subr.bf16.mxu0 %v1809_v8  ;;  %1700 = vmatprep.subr.bf16.mxu1 %v1809_v8 }
  0x86   : > { %1608 = vmatpush3.bf16.msra.mxu0 %v1809_v8  ;;  %1708 = vmatpush3.bf16.msra.mxu1 %v1809_v8 }
  0x87   : > { %1609 = vmatprep.subr.bf16.mxu0 %v1810_v13  ;;  %1701 = vmatprep.subr.bf16.mxu1 %v1810_v13 }
  0x8a   : > { %1610 = vmatpush3.bf16.msra.mxu0 %v1810_v13  ;;  %1709 = vmatpush3.bf16.msra.mxu1 %v1810_v13 }
  0x8b   : > { %1611 = vmatprep.subr.bf16.mxu0 %v1811_v14  ;;  %1702 = vmatprep.subr.bf16.mxu1 %v1811_v14 }
  0x8e   : > { %1612 = vmatpush3.bf16.msra.mxu0 %v1811_v14  ;;  %1710 = vmatpush3.bf16.msra.mxu1 %v1811_v14 }
  0x8f   : > { %1613 = vmatprep.subr.bf16.mxu0 %v1812_v15  ;;  %1703 = vmatprep.subr.bf16.mxu1 %v1812_v15 }
  0x92   : > { %1614 = vmatpush3.bf16.msra.mxu0 %v1812_v15  ;;  %1711 = vmatpush3.bf16.msra.mxu1 %v1812_v15 }
  0x93   : > { %1615 = vmatprep.subr.bf16.mxu0 %v1813_v16  ;;  %1704 = vmatprep.subr.bf16.mxu1 %v1813_v16 }
  0x96   : > { %1616 = vmatpush3.bf16.msra.mxu0 %v1813_v16  ;;  %1712 = vmatpush3.bf16.msra.mxu1 %v1813_v16 }
  0x99   : > { %1618 = vmatmul.mubr.bf16.vlgmr.msra.gmra.mxu0 %v541_v19  ;;  %1626 = vmatmul.mubr.bf16.vlgmr.msra.gmra.mxu1 %v545_v20 }
  0x9a   : > { %1621 = vmatprep.mubr.bf16.mxu0 %v542_v21  ;;  %1629 = vmatprep.mubr.bf16.mxu1 %v546_v22 }
  0xa1   : > { %1622 = vmatmul.mubr.bf16.gmra.mxu0 %v543_v23  ;;  %1630 = vmatmul.mubr.bf16.gmra.mxu1 %v547_v24 }
 0x159   : > { %v1619_v27 = vpop.f32.mrf.mxu0  ;;  %v1627_v28 = vpop.f32.mrf.mxu1 }
 0x15a   : > { %v727_v31 = vadd.f32 %v1619_v27, %v550_v25  ;;  %v735_v32 = vadd.f32 %v1627_v28, %v558_v26 }
 0x15b   : > { %v662_v33 = vpop.f32.mrf.mxu0  ;;  %v694_v34 = vpop.f32.mrf.mxu1 }
 0x15c   : > { %744 = vst.msk [vmem:[#allocation2 + $0x10] sm:$0xff] %vm741_vm1, %v727_v31  ;;  %752 = vst.msk [vmem:[#allocation2 + $0x50] sm:$0xff] %vm741_vm1, %v735_v32  ;;  %v725_v37 = vadd.f32 %v662_v33, %v548_v29  ;;  %v733_v38 = vadd.f32 %v694_v34, %v556_v30 }
 0x15d   : > { %v1620_v39 = vpop.f32.mrf.mxu0  ;;  %v1628_v40 = vpop.f32.mrf.mxu1 }
 0x15e   : > { %742 = vst.msk [vmem:[#allocation2] sm:$0xff] %vm741_vm1, %v725_v37  ;;  %750 = vst.msk [vmem:[#allocation2 + $0x40] sm:$0xff] %vm741_vm1, %v733_v38  ;;  %v728_v43 = vadd.f32 %v1620_v39, %v551_v35  ;;  %v736_v44 = vadd.f32 %v1628_v40, %v559_v36 }
 0x15f   : > { %v665_v45 = vpop.f32.mrf.mxu0  ;;  %v697_v46 = vpop.f32.mrf.mxu1 }
 0x160   : > { %745 = vst.msk [vmem:[#allocation2 + $0x18] sm:$0xff] %vm741_vm1, %v728_v43  ;;  %753 = vst.msk [vmem:[#allocation2 + $0x58] sm:$0xff] %vm741_vm1, %v736_v44  ;;  %v726_v49 = vadd.f32 %v665_v45, %v549_v41  ;;  %v734_v50 = vadd.f32 %v697_v46, %v557_v42 }
 0x161   : > { %v1623_v51 = vpop.f32.mrf.mxu0  ;;  %v1631_v52 = vpop.f32.mrf.mxu1 }
 0x162   : > { %743 = vst.msk [vmem:[#allocation2 + $0x8] sm:$0xff] %vm741_vm1, %v726_v49  ;;  %751 = vst.msk [vmem:[#allocation2 + $0x48] sm:$0xff] %vm741_vm1, %v734_v50  ;;  %v731_v55 = vadd.f32 %v1623_v51, %v554_v47  ;;  %v739_v56 = vadd.f32 %v1631_v52, %v562_v48 }
 0x163   : > { %v678_v57 = vpop.f32.mrf.mxu0  ;;  %v710_v58 = vpop.f32.mrf.mxu1 }
 0x164   : > { %748 = vst.msk [vmem:[#allocation2 + $0x30] sm:$0xff] %vm741_vm1, %v731_v55  ;;  %756 = vst.msk [vmem:[#allocation2 + $0x70] sm:$0xff] %vm741_vm1, %v739_v56  ;;  %v729_v61 = vadd.f32 %v678_v57, %v552_v53  ;;  %v737_v62 = vadd.f32 %v710_v58, %v560_v54 }
 0x165   : > { %v1624_v63 = vpop.f32.mrf.mxu0  ;;  %v1632_v0 = vpop.f32.mrf.mxu1 }
 0x166   : > { %746 = vst.msk [vmem:[#allocation2 + $0x20] sm:$0xff] %vm741_vm1, %v729_v61  ;;  %754 = vst.msk [vmem:[#allocation2 + $0x60] sm:$0xff] %vm741_vm1, %v737_v62  ;;  %v732_v3 = vadd.f32 %v1624_v63, %v555_v59  ;;  %v740_v4 = vadd.f32 %v1632_v0, %v563_v60 }
 0x167   : > { %v681_v5 = vpop.f32.mrf.mxu0  ;;  %v713_v6 = vpop.f32.mrf.mxu1 }
 0x168   : > { %749 = vst.msk [vmem:[#allocation2 + $0x38] sm:$0xff] %vm741_vm1, %v732_v3  ;;  %757 = vst.msk [vmem:[#allocation2 + $0x78] sm:$0xff] %vm741_vm1, %v740_v4  ;;  %v730_v7 = vadd.f32 %v681_v5, %v553_v1  ;;  %v738_v8 = vadd.f32 %v713_v6, %v561_v2 }
 0x16a   : > { %747 = vst.msk [vmem:[#allocation2 + $0x28] sm:$0xff] %vm741_vm1, %v730_v7  ;;  %755 = vst.msk [vmem:[#allocation2 + $0x68] sm:$0xff] %vm741_vm1, %v738_v8 }
 0x16b PF: > { %p1504_p3 = scmp.ne.s32.totalorder %s1934_s22, 2 }
 0x16c   : > { %s2421_s21 = sld [smem:[#allocation19_spill]] (!%p1504_p3) }
 0x16d   : > { %761 = sbr.rel (%p1504_p3) target bundleno = 730 (0x2da), region = 98 }
 0x172   : > { %v780_v9 = vld [vmem:[%s2137_s9 + $0x10] sm:$0xff]  ;;  %v778_v10 = vld [vmem:[%s2137_s9] sm:$0xff]  ;;  %v1955_v11 = vmov 0   ;;  %v781_v12 = vld [vmem:[%s2137_s9 + $0x18] sm:$0xff]  ;;  %vm914_vm2 = vcmask 261120  }
 0x173   : > { %1815 = vset.pattern.permute.xlu1 %v1955_v11  ;;  %1814 = vset.pattern.permute.xlu0 %v1955_v11  ;;  %v779_v13 = vld [vmem:[%s2137_s9 + $0x8] sm:$0xff]  ;;  %v913_v14 = vld [vmem:[%s2395_s7 + $0x18] sm:$0xff]  ;;  %v912_v15 = vld [vmem:[%s2395_s7 + $0x10] sm:$0xff] }
 0x174   : > { %806 = vperm.xlu1 %1815, %v780_v9   ;;  %796 = vperm.xlu0 %1814, %v778_v10   ;;  %v893_v16 = vld [vmem:[%s2394_s6 + $0x18] sm:$0xff]  ;;  %v783_v17 = vld [vmem:[%s2137_s9 + $0x28] sm:$0xff]  ;;  %v782_v18 = vld [vmem:[%s2137_s9 + $0x20] sm:$0xff] }
 0x175   : > { %1633 = vmatprep.subr.mxu0 %v913_v14  ;;  %1665 = vmatprep.subr.mxu1 %v893_v16  ;;  %v892_v19 = vld [vmem:[%s2394_s6 + $0x10] sm:$0xff]  ;;  %v911_v20 = vld [vmem:[%s2395_s7 + $0x8] sm:$0xff]  ;;  %v894_v22 = vld [vmem:[%s2132_s25] sm:$0xff] }
 0x176   : > { %1634 = vmatpush3.msra.mxu0 %v913_v14  ;;  %1666 = vmatpush3.msra.mxu1 %v893_v16  ;;  %v891_v21 = vld [vmem:[%s2394_s6 + $0x8] sm:$0xff]  ;;  %v785_v23 = vld [vmem:[%s2137_s9 + $0x38] sm:$0xff]  ;;  %v784_v24 = vld [vmem:[%s2137_s9 + $0x30] sm:$0xff] }
 0x177   : > { %1635 = vmatprep.subr.mxu0 %v912_v15  ;;  %1667 = vmatprep.subr.mxu1 %v892_v19  ;;  %v910_v25 = vld [vmem:[%s2395_s7] sm:$0xff]  ;;  %v895_v27 = vld [vmem:[%s2132_s25 + $0x8] sm:$0xff]  ;;  %v896_v30 = vld [vmem:[%s2132_s25 + $0x10] sm:$0xff] }
 0x178   : > { %811 = vperm.xlu1 %1815, %v781_v12   ;;  %801 = vperm.xlu0 %1814, %v779_v13   ;;  %v890_v26 = vld [vmem:[%s2394_s6] sm:$0xff]  ;;  %v787_v28 = vld [vmem:[%s2137_s9 + $0x48] sm:$0xff]  ;;  %v897_v31 = vld [vmem:[%s2132_s25 + $0x18] sm:$0xff] }
 0x179   : > { %1636 = vmatpush3.msra.mxu0 %v912_v15  ;;  %1668 = vmatpush3.msra.mxu1 %v892_v19  ;;  %v786_v29 = vld [vmem:[%s2137_s9 + $0x40] sm:$0xff]  ;;  %v789_v32 = vld [vmem:[%s2137_s9 + $0x58] sm:$0xff]  ;;  %v788_v33 = vld [vmem:[%s2137_s9 + $0x50] sm:$0xff] }
 0x17a   : > { %1637 = vmatprep.subr.mxu0 %v911_v20  ;;  %1669 = vmatprep.subr.mxu1 %v891_v21  ;;  %v898_v34 = vld [vmem:[%s2132_s25 + $0x20] sm:$0xff]  ;;  %v899_v35 = vld [vmem:[%s2132_s25 + $0x28] sm:$0xff]  ;;  %v900_v38 = vld [vmem:[%s2132_s25 + $0x30] sm:$0xff] }
 0x17b   : > { %1638 = vmatpush3.msra.mxu0 %v911_v20  ;;  %1641 = vmatprep.mubr.msk.f32.mxu0 %vm914_vm2, %v894_v22  ;;  %v791_v36 = vld [vmem:[%s2137_s9 + $0x68] sm:$0xff]  ;;  %v790_v37 = vld [vmem:[%s2137_s9 + $0x60] sm:$0xff]  ;;  %v901_v39 = vld [vmem:[%s2132_s25 + $0x38] sm:$0xff] }
 0x17c   : > { %821 = vperm.xlu1 %1815, %v783_v17   ;;  %816 = vperm.xlu0 %1814, %v782_v18   ;;  %v793_v40 = vld [vmem:[%s2137_s9 + $0x78] sm:$0xff]  ;;  %v792_v41 = vld [vmem:[%s2137_s9 + $0x70] sm:$0xff]  ;;  %v902_v42 = vld [vmem:[%s2132_s25 + $0x40] sm:$0xff] }
 0x17d   : > { %1639 = vmatprep.subr.mxu0 %v910_v25  ;;  %1670 = vmatpush3.msra.mxu1 %v891_v21  ;;  %v903_v43 = vld [vmem:[%s2132_s25 + $0x48] sm:$0xff]  ;;  %v904_v44 = vld [vmem:[%s2132_s25 + $0x50] sm:$0xff]  ;;  %v905_v45 = vld [vmem:[%s2132_s25 + $0x58] sm:$0xff] }
 0x17e   : > { %1640 = vmatpush3.msra.mxu0 %v910_v25  ;;  %1671 = vmatprep.subr.mxu1 %v890_v26  ;;  %v906_v46 = vld [vmem:[%s2132_s25 + $0x60] sm:$0xff]  ;;  %v907_v47 = vld [vmem:[%s2132_s25 + $0x68] sm:$0xff]  ;;  %v908_v48 = vld [vmem:[%s2132_s25 + $0x70] sm:$0xff] }
 0x17f   : > { %1642 = vmatmul.mubr.msk.f32.vlgmr.msra.gmra.mxu0 %vm914_vm2, %v895_v27  ;;  %1672 = vmatpush3.msra.mxu1 %v890_v26  ;;  %v909_v49 = vld [vmem:[%s2132_s25 + $0x78] sm:$0xff]  ;;  %v762_v50 = vld [vmem:[#allocation2] sm:$0xff]  ;;  %v764_v53 = vld [vmem:[#allocation2 + $0x10] sm:$0xff] }
 0x180   : > { %831 = vperm.xlu1 %1815, %v785_v23   ;;  %826 = vperm.xlu0 %1814, %v784_v24   ;;  %v763_v55 = vld [vmem:[#allocation2 + $0x8] sm:$0xff]  ;;  %v765_v60 = vld [vmem:[#allocation2 + $0x18] sm:$0xff]  ;;  %v766_v61 = vld [vmem:[#allocation2 + $0x20] sm:$0xff] }
 0x181   : > { %1644 = vmatprep.mubr.msk.f32.mxu0 %vm914_vm2, %v896_v30  ;;  %v767_v2 = vld [vmem:[#allocation2 + $0x28] sm:$0xff]  ;;  %v768_v3 = vld [vmem:[#allocation2 + $0x30] sm:$0xff]  ;;  %v769_v8 = vld [vmem:[#allocation2 + $0x38] sm:$0xff] }
 0x182   : > { %v770_v9 = vld [vmem:[#allocation2 + $0x40] sm:$0xff]  ;;  %v771_v14 = vld [vmem:[#allocation2 + $0x48] sm:$0xff]  ;;  %v772_v15 = vld [vmem:[#allocation2 + $0x50] sm:$0xff] }
 0x183   : > { %1645 = vmatmul.mubr.msk.f32.gmra.mxu0 %vm914_vm2, %v897_v31  ;;  %v773_v20 = vld [vmem:[#allocation2 + $0x58] sm:$0xff]  ;;  %v774_v21 = vld [vmem:[#allocation2 + $0x60] sm:$0xff]  ;;  %v775_v26 = vld [vmem:[#allocation2 + $0x68] sm:$0xff] }
 0x184   : > { %841 = vperm.xlu1 %1815, %v787_v28   ;;  %836 = vperm.xlu0 %1814, %v786_v29   ;;  %v776_v27 = vld [vmem:[#allocation2 + $0x70] sm:$0xff] }
 0x185   : > { %1647 = vmatprep.mubr.msk.f32.mxu0 %vm914_vm2, %v898_v34 }
 0x187   : > { %1648 = vmatmul.mubr.msk.f32.gmra.mxu0 %vm914_vm2, %v899_v35 }
 0x188   : > { %851 = vperm.xlu1 %1815, %v789_v32   ;;  %846 = vperm.xlu0 %1814, %v788_v33   ;;  %v777_v32 = vld [vmem:[#allocation2 + $0x78] sm:$0xff] }
 0x189   : > { %1650 = vmatprep.mubr.msk.f32.mxu0 %vm914_vm2, %v900_v38 }
 0x18b   : > { %1651 = vmatmul.mubr.msk.f32.gmra.mxu0 %vm914_vm2, %v901_v39 }
 0x18c   : > { %861 = vperm.xlu1 %1815, %v791_v36   ;;  %856 = vperm.xlu0 %1814, %v790_v37  }
 0x18d   : > { %1653 = vmatprep.mubr.msk.f32.mxu0 %vm914_vm2, %v902_v42 }
 0x18f   : > { %1654 = vmatmul.mubr.msk.f32.gmra.mxu0 %vm914_vm2, %v903_v43  ;;  %v2287_v43 = vld [vmem:[%s2421_s21] ss:$0 sm:$0xff] }
 0x190   : > { %871 = vperm.xlu1 %1815, %v793_v40   ;;  %866 = vperm.xlu0 %1814, %v792_v41  }
 0x191   : > { %1656 = vmatprep.mubr.msk.f32.mxu0 %vm914_vm2, %v904_v44 }
 0x193   : > { %1657 = vmatmul.mubr.msk.f32.gmra.mxu0 %vm914_vm2, %v905_v45 }
 0x194   : > { %1659 = vmatprep.mubr.msk.f32.mxu0 %vm914_vm2, %v906_v46 }
 0x197   : > { %1660 = vmatmul.mubr.msk.f32.gmra.mxu0 %vm914_vm2, %v907_v47 }
 0x198   : > { %1662 = vmatprep.mubr.msk.f32.mxu0 %vm914_vm2, %v908_v48 }
 0x19b   : > { %1663 = vmatmul.mubr.msk.f32.gmra.mxu0 %vm914_vm2, %v909_v49 }
 0x1ef   : > { %v807_v51 = vpop.permute.xlu1 %806  ;;  %v797_v52 = vpop.permute.xlu0 %796 }
 0x1f0   : > { %v874_v54 = vmul.f32 %v797_v52, %v762_v50  ;;  %v876_v56 = vmul.f32 %v807_v51, %v764_v53 }
 0x1f2   : > { %1673 = vmatprep.mubr.msk.f32.mxu1 %vm914_vm2, %v874_v54 }
 0x1f3   : > { %v812_v57 = vpop.permute.xlu1 %811  ;;  %v802_v58 = vpop.permute.xlu0 %801 }
 0x1f4   : > { %v875_v59 = vmul.f32 %v802_v58, %v763_v55  ;;  %v877_v0 = vmul.f32 %v812_v57, %v765_v60 }
 0x1f6   : > { %1674 = vmatmul.mubr.msk.f32.vlgmr.msra.gmra.mxu1 %vm914_vm2, %v875_v59 }
 0x1f7   : > { %v822_v62 = vpop.permute.xlu1 %821  ;;  %v817_v63 = vpop.permute.xlu0 %816  ;;  %1676 = vmatprep.mubr.msk.f32.mxu1 %vm914_vm2, %v876_v56 }
 0x1f8   : > { %v878_v1 = vmul.f32 %v817_v63, %v766_v61  ;;  %v879_v6 = vmul.f32 %v822_v62, %v767_v2 }
 0x1fa   : > { %1677 = vmatmul.mubr.msk.f32.gmra.mxu1 %vm914_vm2, %v877_v0 }
 0x1fb   : > { %v832_v4 = vpop.permute.xlu1 %831  ;;  %v827_v5 = vpop.permute.xlu0 %826  ;;  %1679 = vmatprep.mubr.msk.f32.mxu1 %vm914_vm2, %v878_v1 }
 0x1fc   : > { %v880_v7 = vmul.f32 %v827_v5, %v768_v3  ;;  %v881_v12 = vmul.f32 %v832_v4, %v769_v8 }
 0x1fe   : > { %1680 = vmatmul.mubr.msk.f32.gmra.mxu1 %vm914_vm2, %v879_v6 }
 0x1ff   : > { %v842_v10 = vpop.permute.xlu1 %841  ;;  %v837_v11 = vpop.permute.xlu0 %836  ;;  %1682 = vmatprep.mubr.msk.f32.mxu1 %vm914_vm2, %v880_v7 }
 0x200   : > { %v882_v13 = vmul.f32 %v837_v11, %v770_v9  ;;  %v883_v18 = vmul.f32 %v842_v10, %v771_v14 }
 0x202   : > { %1683 = vmatmul.mubr.msk.f32.gmra.mxu1 %vm914_vm2, %v881_v12 }
 0x203   : > { %v852_v16 = vpop.permute.xlu1 %851  ;;  %v847_v17 = vpop.permute.xlu0 %846  ;;  %1685 = vmatprep.mubr.msk.f32.mxu1 %vm914_vm2, %v882_v13 }
 0x204   : > { %v884_v19 = vmul.f32 %v847_v17, %v772_v15  ;;  %v885_v24 = vmul.f32 %v852_v16, %v773_v20 }
 0x206   : > { %1686 = vmatmul.mubr.msk.f32.gmra.mxu1 %vm914_vm2, %v883_v18 }
 0x207   : > { %v862_v22 = vpop.permute.xlu1 %861  ;;  %v857_v23 = vpop.permute.xlu0 %856  ;;  %1688 = vmatprep.mubr.msk.f32.mxu1 %vm914_vm2, %v884_v19 }
 0x208   : > { %v886_v25 = vmul.f32 %v857_v23, %v774_v21  ;;  %v887_v29 = vmul.f32 %v862_v22, %v775_v26 }
 0x20a   : > { %1689 = vmatmul.mubr.msk.f32.gmra.mxu1 %vm914_vm2, %v885_v24 }
 0x20b   : > { %v867_v28 = vpop.permute.xlu0 %866  ;;  %1691 = vmatprep.mubr.msk.f32.mxu1 %vm914_vm2, %v886_v25  ;;  %v872_v31 = vpop.permute.xlu1 %871 }
 0x20c   : > { %v888_v30 = vmul.f32 %v867_v28, %v776_v27  ;;  %v889_v33 = vmul.f32 %v872_v31, %v777_v32 }
 0x20e   : > { %1692 = vmatmul.mubr.msk.f32.gmra.mxu1 %vm914_vm2, %v887_v29 }
 0x20f   : > { %1694 = vmatprep.mubr.msk.f32.mxu1 %vm914_vm2, %v888_v30 }
 0x212   : > { %1695 = vmatmul.mubr.msk.f32.gmra.mxu1 %vm914_vm2, %v889_v33 }
 0x23f   : > { %v1643_v34 = vpop.f32.mrf.mxu0 }
 0x241   : > { %v1029_v35 = vpop.f32.mrf.mxu0 }
 0x243   : > { %v1646_v36 = vpop.f32.mrf.mxu0 }
 0x245   : > { %v1039_v37 = vpop.f32.mrf.mxu0 }
 0x247   : > { %v1649_v38 = vpop.f32.mrf.mxu0 }
 0x249   : > { %v1049_v39 = vpop.f32.mrf.mxu0 }
 0x24b   : > { %v1652_v40 = vpop.f32.mrf.mxu0 }
 0x24d   : > { %v1059_v41 = vpop.f32.mrf.mxu0 }
 0x24f   : > { %v1655_v46 = vpop.f32.mrf.mxu0 }
 0x251   : > { %v1069_v53 = vpop.f32.mrf.mxu0 }
 0x253   : > { %v1658_v60 = vpop.f32.mrf.mxu0 }
 0x255   : > { %v1079_v3 = vpop.f32.mrf.mxu0 }
 0x257   : > { %v1661_v10 = vpop.f32.mrf.mxu0 }
 0x259   : > { %v1089_v17 = vpop.f32.mrf.mxu0 }
 0x25b   : > { %v1664_v23 = vpop.f32.mrf.mxu0 }
 0x25d   : > { %v1099_v30 = vpop.f32.mrf.mxu0 }
 0x2b6   : > { %v1675_v42 = vpop.f32.mrf.mxu1 }
 0x2b7   : > { %v1228_v44 = vadd.f32 %v1675_v42, %v1643_v34 }
 0x2b8   : > { %v1222_v45 = vpop.f32.mrf.mxu1 }
 0x2b9   : > { %v1309_v47 = vadd.f32 %v2287_v43, %v1228_v44  ;;  %v1223_v48 = vadd.f32 %v1222_v45, %v1029_v35 }
 0x2ba   : > { %v1678_v49 = vpop.f32.mrf.mxu1 }
 0x2bb   : > { %1325 = vst [vmem:[%s2146_s15 + $0x8] sm:$0xff] %v1309_v47  ;;  %v1308_v50 = vadd.f32 %v2287_v43, %v1223_v48  ;;  %v1238_v51 = vadd.f32 %v1678_v49, %v1646_v36 }
 0x2bc   : > { %v1232_v52 = vpop.f32.mrf.mxu1 }
 0x2bd   : > { %1324 = vst [vmem:[%s2146_s15] sm:$0xff] %v1308_v50  ;;  %v1311_v54 = vadd.f32 %v2287_v43, %v1238_v51  ;;  %v1233_v55 = vadd.f32 %v1232_v52, %v1039_v37 }
 0x2be   : > { %v1681_v56 = vpop.f32.mrf.mxu1 }
 0x2bf   : > { %1327 = vst [vmem:[%s2146_s15 + $0x18] sm:$0xff] %v1311_v54  ;;  %v1310_v57 = vadd.f32 %v2287_v43, %v1233_v55  ;;  %v1248_v58 = vadd.f32 %v1681_v56, %v1649_v38 }
 0x2c0   : > { %v1242_v59 = vpop.f32.mrf.mxu1 }
 0x2c1   : > { %1326 = vst [vmem:[%s2146_s15 + $0x10] sm:$0xff] %v1310_v57  ;;  %v1313_v61 = vadd.f32 %v2287_v43, %v1248_v58  ;;  %v1243_v62 = vadd.f32 %v1242_v59, %v1049_v39 }
 0x2c2   : > { %v1684_v63 = vpop.f32.mrf.mxu1 }
 0x2c3   : > { %1329 = vst [vmem:[%s2146_s15 + $0x28] sm:$0xff] %v1313_v61  ;;  %v1312_v0 = vadd.f32 %v2287_v43, %v1243_v62  ;;  %v1258_v1 = vadd.f32 %v1684_v63, %v1652_v40 }
 0x2c4   : > { %v1252_v2 = vpop.f32.mrf.mxu1 }
 0x2c5   : > { %1328 = vst [vmem:[%s2146_s15 + $0x20] sm:$0xff] %v1312_v0  ;;  %v1315_v4 = vadd.f32 %v2287_v43, %v1258_v1  ;;  %v1253_v5 = vadd.f32 %v1252_v2, %v1059_v41 }
 0x2c6   : > { %v1687_v6 = vpop.f32.mrf.mxu1 }
 0x2c7   : > { %1331 = vst [vmem:[%s2146_s15 + $0x38] sm:$0xff] %v1315_v4  ;;  %v1314_v7 = vadd.f32 %v2287_v43, %v1253_v5  ;;  %v1268_v8 = vadd.f32 %v1687_v6, %v1655_v46 }
 0x2c8   : > { %v1262_v9 = vpop.f32.mrf.mxu1 }
 0x2c9   : > { %1330 = vst [vmem:[%s2146_s15 + $0x30] sm:$0xff] %v1314_v7  ;;  %v1317_v11 = vadd.f32 %v2287_v43, %v1268_v8  ;;  %v1263_v12 = vadd.f32 %v1262_v9, %v1069_v53 }
 0x2ca   : > { %v1690_v13 = vpop.f32.mrf.mxu1 }
 0x2cb   : > { %1333 = vst [vmem:[%s2146_s15 + $0x48] sm:$0xff] %v1317_v11  ;;  %v1316_v14 = vadd.f32 %v2287_v43, %v1263_v12  ;;  %v1278_v15 = vadd.f32 %v1690_v13, %v1658_v60 }
 0x2cc   : > { %v1272_v16 = vpop.f32.mrf.mxu1 }
 0x2cd   : > { %1332 = vst [vmem:[%s2146_s15 + $0x40] sm:$0xff] %v1316_v14  ;;  %v1319_v18 = vadd.f32 %v2287_v43, %v1278_v15  ;;  %v1273_v19 = vadd.f32 %v1272_v16, %v1079_v3 }
 0x2ce   : > { %v1693_v20 = vpop.f32.mrf.mxu1 }
 0x2cf   : > { %1335 = vst [vmem:[%s2146_s15 + $0x58] sm:$0xff] %v1319_v18  ;;  %v1318_v21 = vadd.f32 %v2287_v43, %v1273_v19  ;;  %v1288_v22 = vadd.f32 %v1693_v20, %v1661_v10 }
 0x2d0   : > { %v1282_v24 = vpop.f32.mrf.mxu1 }
 0x2d1   : > { %1334 = vst [vmem:[%s2146_s15 + $0x50] sm:$0xff] %v1318_v21  ;;  %v1321_v25 = vadd.f32 %v2287_v43, %v1288_v22  ;;  %v1283_v26 = vadd.f32 %v1282_v24, %v1089_v17 }
 0x2d2   : > { %v1696_v27 = vpop.f32.mrf.mxu1 }
 0x2d3   : > { %1337 = vst [vmem:[%s2146_s15 + $0x68] sm:$0xff] %v1321_v25  ;;  %v1320_v28 = vadd.f32 %v2287_v43, %v1283_v26  ;;  %v1298_v29 = vadd.f32 %v1696_v27, %v1664_v23 }
 0x2d4   : > { %v1292_v31 = vpop.f32.mrf.mxu1 }
 0x2d5   : > { %1336 = vst [vmem:[%s2146_s15 + $0x60] sm:$0xff] %v1320_v28  ;;  %v1323_v32 = vadd.f32 %v2287_v43, %v1298_v29  ;;  %v1293_v33 = vadd.f32 %v1292_v31, %v1099_v30 }
 0x2d7   : > { %1339 = vst [vmem:[%s2146_s15 + $0x78] sm:$0xff] %v1323_v32  ;;  %v1322_v34 = vadd.f32 %v2287_v43, %v1293_v33 }
 0x2d9   : > { %1338 = vst [vmem:[%s2146_s15 + $0x70] sm:$0xff] %v1322_v34 }
 0x2da PF: > { %s1544_s29 = sshll.u32 %s1938_s23, 11  ;;  %s2422_s14 = sld [smem:[#allocation20_spill]] }
 0x2db   : > { %s1354_s11 = sshll.u32 %s2146_s15, 4  ;;  %s2423_s30 = sand.u32 1, %s1918_s18   ;;  %s2328_s11 = int_to_ptr.vmem [resolvable:$true] %s1354_s11 }
 0x2dc   : > { %s2332_s17 = scalar_lea.sflag [#allocation8], %s2423_s30  ;;  %s1840_s27 = scalar_lea.vmem %s2328_s11, 2048 }
 0x2dd   : > { %p1841_p4 = scmp.ne.s32.totalorder %s2328_s11, %s1840_s27  ;;  %s1956_s23 = smov [#allocation7]  }
 0x2de   : > { %s1844_s20 = sshll.u32 %s1956_s23, 4  ;;  %s1845_s20 = int_to_ptr.vmem [resolvable:$false] %s1844_s20 }
 0x2df   : > { %p1842_p5 = pnand %p1841_p4, %p2099_p6  ;;  %s1846_s10 = scalar_lea.vmem %s1845_s20, 4096 }
 0x2e0   : > { %s2325_s13 = scalar_lea.hbm %s2422_s14, %s1544_s29  ;;  %p1847_p9 = scmp.lt.s32.totalorder %s2328_s11, %s1845_s20 }
 0x2e1   : > { %p1843_p8 = pneg %p1842_p5  ;;  %p1848_p10 = scmp.lt.s32.totalorder %s1846_s10, %s1840_s27 }
 0x2e3   : > { %p1849_p11 = por %p1848_p10, %p1847_p9 }
 0x2e5   : > { %p1850_p12 = pnand %p1849_p11, %p1843_p8 }
 0x2e7   : > { %1853 = shalt.err (!%p1850_p12)
}
 0x2e8   : > { %s1854_s15 = scalar_lea.hbm %s2325_s13, 2048  ;;  %s1858_s12 = scalar_lea.hbm %s2422_s14, 8192 }
 0x2e9   : > { %p1855_p13 = scmp.ne.s32.totalorder %s2325_s13, %s1854_s15  ;;  %p1859_p2 = scmp.lt.s32.totalorder %s2325_s13, %s2422_s14 }
 0x2ea   : > { %p1860_p3 = scmp.lt.s32.totalorder %s1858_s12, %s1854_s15 }
 0x2eb   : > { %p1856_p0 = pnand %p1855_p13, %p2099_p6 }
 0x2ec   : > { %p1861_p4 = por %p1860_p3, %p1859_p2 }
 0x2ed   : > { %p1857_p1 = pneg %p1856_p0 }
 0x2ef   : > { %p1862_p5 = pnand %p1861_p4, %p1857_p1 }
 0x2f1   : > { %1865 = shalt.err (!%p1862_p5)
}
 0x2f2   : > { %s1957_s9 = smov 128   ;;  %s1958_s21 = smov 8  }
 0x2f3   : > { %1713 = dma.vmem_to_hbm [thread:$0]  (%p2099_p6), %s2328_s11, 2048, %s2325_s13, %s2332_s17, %s1957_s9, %s1957_s9, %s1958_s21  }
 0x2f4 PF: > { %p1719_p8 = scmp.ge.s32.totalorder %s1950_s26, 2  ;;  %s1369_s29 = sand.u32 1, %s1914_s1  }
 0x2f5   : > { %s1370_s22 = scalar_lea.sflag [#allocation8], %s1369_s29 }
 0x2f6   : > { %p1716_p9 = pnand %p1719_p8, %p2103_p7 }
 0x2f8   : > { %p1717_p10 = pneg %p1716_p9 }
 0x2fa   : > { %1909 = dma.done.wait (%p1717_p10), %s1370_s22, 2048  }
 0x2fb   : > { %1911 = vsyncadd (%p1717_p10), %s1370_s22, 4294965248  ;;  %s32_s26 = sadd.s32 1, %s1950_s26   ;;  %s2424_s28 = sld [smem:[#allocation16_spill]] }
 0x2fc   : > { %p29_p11 = scmp.ge.s32.totalorder %s32_s26, 14   ;;  %s2425_s20 = sld [smem:[#allocation11_spill]] }
 0x2fd   : > { %s2426_s21 = sld [smem:[#allocation17_spill]]  ;;  %s2431_s1 = smov %s1918_s18 }
 0x2fe   : > { %s2427_s22 = sld [smem:[#allocation12_spill]]  ;;  %s2432_s18 = smov %s1922_s19 }
 0x2ff   : > { %s2428_s23 = sld [smem:[#allocation13_spill]]  ;;  %31 = sbr.rel (!%p29_p11) target bundleno = 33 (0x21), region = 147 }
 0x300   : > { %s2429_s24 = sld [smem:[#allocation14_spill]] }
 0x301   : > { %s2430_s25 = sld [smem:[#allocation15_spill]]  ;;  %s2433_s19 = smov %s2424_s28 }
 0x304   :  { %1375 = vsyncpa [#allocation8], 1 }
 0x305   :  { %1377 = vsyncpa [#allocation8 + $0x1], 1 }

</bundles_post_ra>
